<compile_context>
chip_gen: v5e
topology: v5e:2x2
jax: 0.10.0
libtpu: 0.0.40
codegen_flags: <defaults>
</compile_context>

<pallas_src>
import jax
import jax.numpy as jnp
from jax.experimental import pallas as pl
from jax.experimental.pallas import tpu as pltpu

_LANE = 128
_BF16_SUBLANE = 16  # minimum native sublane tile for bf16


def _round_up(x, m):
    return ((x + m - 1) // m) * m


def _elu(v, alpha=0.2):
    # torch nn.ELU(alpha=0.2): x if x > 0 else alpha * (exp(x) - 1).
    # No clamp needed: the untaken exp branch may be inf, but `where` simply
    # selects v there (no NaN is produced).
    one = jnp.asarray(1.0, v.dtype)
    a = jnp.asarray(alpha, v.dtype)
    return jnp.where(v > 0, v, a * (jnp.exp(v) - one))


def generator_mnist_kernel(x_ref,
                           w1_ref, b1_ref,
                           w2_ref, b2_ref,
                           w3_ref, b3_ref,
                           w4_ref, b4_ref,
                           o_ref):
    # bf16 operands on the MXU, f32 accumulation; elementwise epilogue in bf16.
    h = jnp.dot(x_ref[...], w1_ref[...], preferred_element_type=jnp.float32) + b1_ref[...]
    h = _elu(h.astype(jnp.bfloat16))
    h = jnp.dot(h, w2_ref[...], preferred_element_type=jnp.float32) + b2_ref[...]
    h = _elu(h.astype(jnp.bfloat16))
    h = jnp.dot(h, w3_ref[...], preferred_element_type=jnp.float32) + b3_ref[...]
    h = _elu(h.astype(jnp.bfloat16))
    h = jnp.dot(h, w4_ref[...], preferred_element_type=jnp.float32) + b4_ref[...]
    o_ref[...] = jnp.tanh(h.astype(jnp.bfloat16)).astype(o_ref.dtype)


def _pad_params(params):
    """Zero-pad (in,out) weights / (1,out) biases to 128-multiples; weights -> bf16.

    Padding is exact: padded features get bias 0 -> ELU(0)=0 -> hit zero rows of
    the next (padded) weight, so real outputs are unchanged.
    """
    padded = []
    for w, b in params:
        din, dout = w.shape
        din_p, dout_p = _round_up(din, _LANE), _round_up(dout, _LANE)
        w_p = jnp.zeros((din_p, dout_p), jnp.bfloat16).at[:din, :dout].set(
            w.astype(jnp.bfloat16))
        b_p = jnp.zeros((1, dout_p), jnp.float32).at[:, :dout].set(
            b.astype(jnp.float32))
        padded.append((w_p, b_p))
    return tuple(padded)


def _choose_batch_tile(B, block_rows):
    """Pick (tile_rows, num_tiles): 16-aligned tiles, >=2 grid steps when the
    batch allows it (v7x megacore), minimal padding waste."""
    block_rows = max(_BF16_SUBLANE, _round_up(block_rows, _BF16_SUBLANE))
    if B <= _BF16_SUBLANE:
        return _BF16_SUBLANE, 1
    n_tiles = max(2, pl.cdiv(B, block_rows))
    tb = min(block_rows, _round_up(pl.cdiv(B, n_tiles), _BF16_SUBLANE))
    n_tiles = pl.cdiv(B, tb)
    return tb, n_tiles


def _vmem_limit_bytes(tb, z_pad, d_pad, pparams, out_itemsize):
    w_bytes = sum(wp.size * 2 + bp.size * 4 for wp, bp in pparams)  # single-buffered
    x_bytes = 2 * tb * z_pad * 2                                    # double-buffered bf16
    o_bytes = 2 * tb * d_pad * out_itemsize                         # double-buffered
    h_max = max(wp.shape[1] for wp, _ in pparams)
    act_bytes = 3 * tb * h_max * 4                                  # f32/bf16 temporaries
    est = w_bytes + x_bytes + o_bytes + act_bytes
    return int(min(max(2 * est, 32 * 1024 * 1024), 100 * 1024 * 1024))


def _resident_spec(shape, index_map):
    # Single-buffer resident (grid-invariant) operands; fall back gracefully if
    # this jax version's BlockSpec lacks pipeline_mode.
    try:
        return pl.BlockSpec(shape, index_map, pipeline_mode=pl.Buffered(1))
    except TypeError:
        return pl.BlockSpec(shape, index_map)


def _generator_forward(x, flat_params, *, z_dim, data_dim, block_rows, out_dtype):
    w1p, b1p, w2p, b2p, w3p, b3p, w4p, b4p = flat_params
    pparams = ((w1p, b1p), (w2p, b2p), (w3p, b3p), (w4p, b4p))

    B = x.shape[0]
    z_pad = w1p.shape[0]
    d_pad = w4p.shape[1]

    tb, n_tiles = _choose_batch_tile(B, block_rows)
    b_pad = tb * n_tiles

    # Only per-call padding left: the input tile (bf16, lane-dense).
    x_p = jnp.zeros((b_pad, z_pad), jnp.bfloat16).at[:B, :z_dim].set(
        x.astype(jnp.bfloat16))

    tile_map = lambda i: (i, 0)       # batch-tiled operands
    resident_map = lambda i: (0, 0)   # weights/biases resident across the grid

    in_specs = [pl.BlockSpec((tb, z_pad), tile_map)]
    for wp, bp in pparams:
        in_specs.append(_resident_spec(wp.shape, resident_map))
        in_specs.append(_resident_spec(bp.shape, resident_map))
    out_specs = pl.BlockSpec((tb, d_pad), tile_map)

    kernel_out_dtype = jnp.bfloat16  # halves out-tile HBM stream and VMEM

    dims = [(wp.shape[0], wp.shape[1]) for wp, _ in pparams]
    flops = 2 * b_pad * sum(di * do for di, do in dims)
    transcendentals = b_pad * sum(do for _, do in dims)  # 3x ELU exp + final tanh
    bytes_accessed = int(
        x_p.size * 2
        + sum(wp.size * 2 + bp.size * 4 for wp, bp in pparams)
        + b_pad * d_pad * 2
    )

    out_padded = pl.pallas_call(
        generator_mnist_kernel,
        out_shape=jax.ShapeDtypeStruct((b_pad, d_pad), kernel_out_dtype),
        grid=(n_tiles,),
        in_specs=in_specs,
        out_specs=out_specs,
        compiler_params=pltpu.CompilerParams(
            dimension_semantics=("parallel",),
            vmem_limit_bytes=_vmem_limit_bytes(tb, z_pad, d_pad, pparams, 2),
        ),
        cost_estimate=pl.CostEstimate(
            flops=flops,
            transcendentals=transcendentals,
            bytes_accessed=bytes_accessed,
        ),
    )(x_p, w1p, b1p, w2p, b2p, w3p, b3p, w4p, b4p)

    # Strip batch / feature padding, upcast outside the kernel.
    return out_padded[:B, :data_dim].astype(out_dtype)


def make_generator_mnist(params, *, block_rows=1024, out_dtype=jnp.float32):
    """Prepare padded bf16 params ONCE and return a jitted forward(x)."""
    z_dim = params[0][0].shape[0]
    data_dim = params[-1][0].shape[1]
    pparams = _pad_params(params)
    flat = tuple(a for pair in pparams for a in pair)

    fwd = jax.jit(lambda xx, fp: _generator_forward(
        xx, fp, z_dim=z_dim, data_dim=data_dim,
        block_rows=block_rows, out_dtype=out_dtype))

    def forward(x):
        return fwd(x, flat)

    return forward


def init_params(key, z_dim, hidden_size, data_dim):
    """Deterministic synthetic params. Weights stored as (in, out); bias (1, out)."""
    dims = [
        (z_dim, hidden_size),                # fc1
        (hidden_size, hidden_size * 2),      # fc2
        (hidden_size * 2, hidden_size * 4),  # fc3
        (hidden_size * 4, data_dim),         # fc4
    ]
    params = []
    for (din, dout) in dims:
        key, kw, kb = jax.random.split(key, 3)
        scale = 1.0 / jnp.sqrt(jnp.float32(din))  # ~ torch Linear default range
        w = jax.random.uniform(kw, (din, dout), jnp.float32, -scale, scale)
        b = jax.random.uniform(kb, (1, dout), jnp.float32, -scale, scale)
        params.append((w, b))
    return params


def reference_forward(x, params):
    (w1, b1), (w2, b2), (w3, b3), (w4, b4) = params
    h = _elu(x @ w1 + b1)
    h = _elu(h @ w2 + b2)
    h = _elu(h @ w3 + b3)
    return jnp.tanh(h @ w4 + b4)


if __name__ == "__main__":
    batch = 8
    z_dim = 16
    hidden_size = 32
    data_dim = 64

    key = jax.random.PRNGKey(0)
    key, kx = jax.random.split(key)
    x = jax.random.normal(kx, (batch, z_dim), jnp.float32)
    params = init_params(key, z_dim, hidden_size, data_dim)

    forward = make_generator_mnist(params)
    out = jax.block_until_ready(forward(x))

    # Like-for-like reference: bf16-quantized weights AND input, computed in f32.
    ref_params = [(w.astype(jnp.bfloat16).astype(jnp.float32), b) for w, b in params]
    x_ref = x.astype(jnp.bfloat16).astype(jnp.float32)
    ref = reference_forward(x_ref, ref_params)

    assert out.shape == (batch, data_dim)
    assert jnp.allclose(out, ref, atol=3e-2, rtol=3e-2), float(
        jnp.max(jnp.abs(out - ref)))

    print("KERNEL_OK")
</pallas_src>

<mosaic_0001>
module attributes {stable_mosaic.version = 11 : i64} {
  func.func @generator_mnist_kernel(%arg0: i32, %arg1: memref<16x128xbf16, #tpu.memory_space<vmem>>, %arg2: memref<128x128xbf16, #tpu.memory_space<vmem>>, %arg3: memref<1x128xf32, #tpu.memory_space<vmem>>, %arg4: memref<128x128xbf16, #tpu.memory_space<vmem>>, %arg5: memref<1x128xf32, #tpu.memory_space<vmem>>, %arg6: memref<128x128xbf16, #tpu.memory_space<vmem>>, %arg7: memref<1x128xf32, #tpu.memory_space<vmem>>, %arg8: memref<128x128xbf16, #tpu.memory_space<vmem>>, %arg9: memref<1x128xf32, #tpu.memory_space<vmem>>, %arg10: memref<16x128xbf16, #tpu.memory_space<vmem>>) attributes {dimension_semantics = [#tpu.dimension_semantics<parallel>], iteration_bounds = array<i64: 1>, scalar_prefetch = 0 : i64, scratch_operands = 0 : i64, tpu.core_type = #tpu.core_type<tc>, window_params = [{transform_indices = @transform_0, window_bounds = array<i64: 16, 128>}, {pipeline_mode = #tpu.pipeline_mode<synchronous>, transform_indices = @transform_1, window_bounds = array<i64: 128, 128>}, {pipeline_mode = #tpu.pipeline_mode<synchronous>, transform_indices = @transform_2, window_bounds = array<i64: 1, 128>}, {pipeline_mode = #tpu.pipeline_mode<synchronous>, transform_indices = @transform_3, window_bounds = array<i64: 128, 128>}, {pipeline_mode = #tpu.pipeline_mode<synchronous>, transform_indices = @transform_4, window_bounds = array<i64: 1, 128>}, {pipeline_mode = #tpu.pipeline_mode<synchronous>, transform_indices = @transform_5, window_bounds = array<i64: 128, 128>}, {pipeline_mode = #tpu.pipeline_mode<synchronous>, transform_indices = @transform_6, window_bounds = array<i64: 1, 128>}, {pipeline_mode = #tpu.pipeline_mode<synchronous>, transform_indices = @transform_7, window_bounds = array<i64: 128, 128>}, {pipeline_mode = #tpu.pipeline_mode<synchronous>, transform_indices = @transform_8, window_bounds = array<i64: 1, 128>}, {transform_indices = @transform_9, window_bounds = array<i64: 16, 128>}]} {
    %c0 = arith.constant 0 : index
    %c0_0 = arith.constant 0 : index
    %0 = vector.load %arg1[%c0, %c0_0] : memref<16x128xbf16, #tpu.memory_space<vmem>>, vector<16x128xbf16>
    %c0_1 = arith.constant 0 : index
    %c0_2 = arith.constant 0 : index
    %1 = vector.load %arg2[%c0_1, %c0_2] : memref<128x128xbf16, #tpu.memory_space<vmem>>, vector<128x128xbf16>
    %cst = arith.constant dense<0.000000e+00> : vector<16x128xf32>
    %2 = tpu.matmul %0, %1, %cst {dimension_numbers = #tpu.dot_dimension_numbers<[1], [0], [0], [1], [0, 0, 1, 1], [], []>} : vector<16x128xbf16>, vector<128x128xbf16>, vector<16x128xf32> -> vector<16x128xf32>
    %c0_3 = arith.constant 0 : index
    %c0_4 = arith.constant 0 : index
    %3 = vector.load %arg3[%c0_3, %c0_4] : memref<1x128xf32, #tpu.memory_space<vmem>>, vector<1x128xf32>
    %4 = vector.broadcast %3 : vector<1x128xf32> to vector<16x128xf32>
    %5 = arith.addf %2, %4 : vector<16x128xf32>
    %6 = arith.truncf %5 : vector<16x128xf32> to vector<16x128xbf16>
    %cst_5 = arith.constant 0.000000e+00 : bf16
    %7 = vector.broadcast %cst_5 : bf16 to vector<16x128xbf16>
    %8 = arith.cmpf ogt, %6, %7 : vector<16x128xbf16>
    %9 = math.exp %6 : vector<16x128xbf16>
    %cst_6 = arith.constant 1.000000e+00 : bf16
    %10 = vector.broadcast %cst_6 : bf16 to vector<16x128xbf16>
    %11 = arith.subf %9, %10 : vector<16x128xbf16>
    %cst_7 = arith.constant 2.001950e-01 : bf16
    %12 = vector.broadcast %cst_7 : bf16 to vector<16x128xbf16>
    %13 = arith.mulf %12, %11 : vector<16x128xbf16>
    %14 = arith.select %8, %6, %13 : vector<16x128xi1>, vector<16x128xbf16>
    %c0_8 = arith.constant 0 : index
    %c0_9 = arith.constant 0 : index
    %15 = vector.load %arg4[%c0_8, %c0_9] : memref<128x128xbf16, #tpu.memory_space<vmem>>, vector<128x128xbf16>
    %cst_10 = arith.constant dense<0.000000e+00> : vector<16x128xf32>
    %16 = tpu.matmul %14, %15, %cst_10 {dimension_numbers = #tpu.dot_dimension_numbers<[1], [0], [0], [1], [0, 0, 1, 1], [], []>} : vector<16x128xbf16>, vector<128x128xbf16>, vector<16x128xf32> -> vector<16x128xf32>
    %c0_11 = arith.constant 0 : index
    %c0_12 = arith.constant 0 : index
    %17 = vector.load %arg5[%c0_11, %c0_12] : memref<1x128xf32, #tpu.memory_space<vmem>>, vector<1x128xf32>
    %18 = vector.broadcast %17 : vector<1x128xf32> to vector<16x128xf32>
    %19 = arith.addf %16, %18 : vector<16x128xf32>
    %20 = arith.truncf %19 : vector<16x128xf32> to vector<16x128xbf16>
    %cst_13 = arith.constant 0.000000e+00 : bf16
    %21 = vector.broadcast %cst_13 : bf16 to vector<16x128xbf16>
    %22 = arith.cmpf ogt, %20, %21 : vector<16x128xbf16>
    %23 = math.exp %20 : vector<16x128xbf16>
    %cst_14 = arith.constant 1.000000e+00 : bf16
    %24 = vector.broadcast %cst_14 : bf16 to vector<16x128xbf16>
    %25 = arith.subf %23, %24 : vector<16x128xbf16>
    %cst_15 = arith.constant 2.001950e-01 : bf16
    %26 = vector.broadcast %cst_15 : bf16 to vector<16x128xbf16>
    %27 = arith.mulf %26, %25 : vector<16x128xbf16>
    %28 = arith.select %22, %20, %27 : vector<16x128xi1>, vector<16x128xbf16>
    %c0_16 = arith.constant 0 : index
    %c0_17 = arith.constant 0 : index
    %29 = vector.load %arg6[%c0_16, %c0_17] : memref<128x128xbf16, #tpu.memory_space<vmem>>, vector<128x128xbf16>
    %cst_18 = arith.constant dense<0.000000e+00> : vector<16x128xf32>
    %30 = tpu.matmul %28, %29, %cst_18 {dimension_numbers = #tpu.dot_dimension_numbers<[1], [0], [0], [1], [0, 0, 1, 1], [], []>} : vector<16x128xbf16>, vector<128x128xbf16>, vector<16x128xf32> -> vector<16x128xf32>
    %c0_19 = arith.constant 0 : index
    %c0_20 = arith.constant 0 : index
    %31 = vector.load %arg7[%c0_19, %c0_20] : memref<1x128xf32, #tpu.memory_space<vmem>>, vector<1x128xf32>
    %32 = vector.broadcast %31 : vector<1x128xf32> to vector<16x128xf32>
    %33 = arith.addf %30, %32 : vector<16x128xf32>
    %34 = arith.truncf %33 : vector<16x128xf32> to vector<16x128xbf16>
    %cst_21 = arith.constant 0.000000e+00 : bf16
    %35 = vector.broadcast %cst_21 : bf16 to vector<16x128xbf16>
    %36 = arith.cmpf ogt, %34, %35 : vector<16x128xbf16>
    %37 = math.exp %34 : vector<16x128xbf16>
    %cst_22 = arith.constant 1.000000e+00 : bf16
    %38 = vector.broadcast %cst_22 : bf16 to vector<16x128xbf16>
    %39 = arith.subf %37, %38 : vector<16x128xbf16>
    %cst_23 = arith.constant 2.001950e-01 : bf16
    %40 = vector.broadcast %cst_23 : bf16 to vector<16x128xbf16>
    %41 = arith.mulf %40, %39 : vector<16x128xbf16>
    %42 = arith.select %36, %34, %41 : vector<16x128xi1>, vector<16x128xbf16>
    %c0_24 = arith.constant 0 : index
    %c0_25 = arith.constant 0 : index
    %43 = vector.load %arg8[%c0_24, %c0_25] : memref<128x128xbf16, #tpu.memory_space<vmem>>, vector<128x128xbf16>
    %cst_26 = arith.constant dense<0.000000e+00> : vector<16x128xf32>
    %44 = tpu.matmul %42, %43, %cst_26 {dimension_numbers = #tpu.dot_dimension_numbers<[1], [0], [0], [1], [0, 0, 1, 1], [], []>} : vector<16x128xbf16>, vector<128x128xbf16>, vector<16x128xf32> -> vector<16x128xf32>
    %c0_27 = arith.constant 0 : index
    %c0_28 = arith.constant 0 : index
    %45 = vector.load %arg9[%c0_27, %c0_28] : memref<1x128xf32, #tpu.memory_space<vmem>>, vector<1x128xf32>
    %46 = vector.broadcast %45 : vector<1x128xf32> to vector<16x128xf32>
    %47 = arith.addf %44, %46 : vector<16x128xf32>
    %48 = arith.truncf %47 : vector<16x128xf32> to vector<16x128xbf16>
    %49 = math.tanh %48 : vector<16x128xbf16>
    %c0_29 = arith.constant 0 : index
    %c0_30 = arith.constant 0 : index
    %50 = vector.load %arg10[%c0_29, %c0_30] : memref<16x128xbf16, #tpu.memory_space<vmem>>, vector<16x128xbf16>
    tpu.vector_store %arg10[%c0_29, %c0_30], %49 {strides = array<i32>} : memref<16x128xbf16, #tpu.memory_space<vmem>>, vector<16x128xbf16>,
    return
  }
  func.func @transform_0(%arg0: i32) -> (i32, i32) {
    %c0_i32 = arith.constant 0 : i32
    %c0_i32_0 = arith.constant 0 : i32
    return %arg0, %c0_i32 : i32, i32
  }
  func.func @transform_1(%arg0: i32) -> (i32, i32) {
    %c0_i32 = arith.constant 0 : i32
    %c0_i32_0 = arith.constant 0 : i32
    %c0_i32_1 = arith.constant 0 : i32
    return %c0_i32, %c0_i32_0 : i32, i32
  }
  func.func @transform_2(%arg0: i32) -> (i32, i32) {
    %c0_i32 = arith.constant 0 : i32
    %c0_i32_0 = arith.constant 0 : i32
    %c0_i32_1 = arith.constant 0 : i32
    return %c0_i32, %c0_i32_0 : i32, i32
  }
  func.func @transform_3(%arg0: i32) -> (i32, i32) {
    %c0_i32 = arith.constant 0 : i32
    %c0_i32_0 = arith.constant 0 : i32
    %c0_i32_1 = arith.constant 0 : i32
    return %c0_i32, %c0_i32_0 : i32, i32
  }
  func.func @transform_4(%arg0: i32) -> (i32, i32) {
    %c0_i32 = arith.constant 0 : i32
    %c0_i32_0 = arith.constant 0 : i32
    %c0_i32_1 = arith.constant 0 : i32
    return %c0_i32, %c0_i32_0 : i32, i32
  }
  func.func @transform_5(%arg0: i32) -> (i32, i32) {
    %c0_i32 = arith.constant 0 : i32
    %c0_i32_0 = arith.constant 0 : i32
    %c0_i32_1 = arith.constant 0 : i32
    return %c0_i32, %c0_i32_0 : i32, i32
  }
  func.func @transform_6(%arg0: i32) -> (i32, i32) {
    %c0_i32 = arith.constant 0 : i32
    %c0_i32_0 = arith.constant 0 : i32
    %c0_i32_1 = arith.constant 0 : i32
    return %c0_i32, %c0_i32_0 : i32, i32
  }
  func.func @transform_7(%arg0: i32) -> (i32, i32) {
    %c0_i32 = arith.constant 0 : i32
    %c0_i32_0 = arith.constant 0 : i32
    %c0_i32_1 = arith.constant 0 : i32
    return %c0_i32, %c0_i32_0 : i32, i32
  }
  func.func @transform_8(%arg0: i32) -> (i32, i32) {
    %c0_i32 = arith.constant 0 : i32
    %c0_i32_0 = arith.constant 0 : i32
    %c0_i32_1 = arith.constant 0 : i32
    return %c0_i32, %c0_i32_0 : i32, i32
  }
  func.func @transform_9(%arg0: i32) -> (i32, i32) {
    %c0_i32 = arith.constant 0 : i32
    %c0_i32_0 = arith.constant 0 : i32
    return %arg0, %c0_i32 : i32, i32
  }
}

</mosaic_0001>

<bundles_post_ra>
// kernel: _lambda_.1
= control target key start
LH: loop header
LB: loop body
LE: loop exit
PB: predicated region body
PF: predicated region fallthrough
CT: control target
= control target key end

     0   :  { %14 = vsyncpa [#allocation3], 0  ;;  %s940_s0 = inlined_call_operand.vmem [shape: bf16[16,128], index: 0, kind: input, shape index: {}]   ;;  %s941_s1 = inlined_call_operand.hbm [shape: bf16[128,128], index: 1, kind: input, shape index: {}]   ;;  %s942_s2 = inlined_call_operand.vmem [shape: f32[1,128], index: 2, kind: input, shape index: {}]   ;;  %s943_s3 = inlined_call_operand.hbm [shape: bf16[128,128], index: 3, kind: input, shape index: {}]   ;;  %s944_s4 = inlined_call_operand.vmem [shape: f32[1,128], index: 4, kind: input, shape index: {}]   ;;  %s945_s5 = inlined_call_operand.hbm [shape: bf16[128,128], index: 5, kind: input, shape index: {}]   ;;  %s946_s6 = inlined_call_operand.vmem [shape: f32[1,128], index: 6, kind: input, shape index: {}]   ;;  %s947_s7 = inlined_call_operand.hbm [shape: bf16[128,128], index: 7, kind: input, shape index: {}]   ;;  %s948_s8 = inlined_call_operand.vmem [shape: f32[1,128], index: 8, kind: input, shape index: {}]   ;;  %s949_s9 = inlined_call_operand.vmem [shape: bf16[16,128], index: 9, kind: output, shape index: {}]  }
   0x1   :  { %15 = vsyncpa [#allocation5], 0 }
   0x2   :  { %16 = vsyncpa [#allocation8], 0  ;;  %s38_s11 = sshll.u32 %s943_s3, 4  ;;  %s854_s12 = smov [#allocation4]   ;;  %s39_s11 = int_to_ptr.hbm [resolvable:$true] %s38_s11 }
   0x3   :  { %s40_s13 = sshll.u32 %s854_s12, 4  ;;  %s23_s16 = sshll.u32 %s941_s1, 4  ;;  %s41_s13 = int_to_ptr.vmem [resolvable:$true] %s40_s13  ;;  %s24_s16 = int_to_ptr.hbm [resolvable:$true] %s23_s16 }
   0x4   :  { %s855_s17 = smov 64   ;;  %s856_s18 = smov 4  }
   0x5   :  { %46 = dma.hbm_to_vmem [thread:$0]  %s39_s11, 1024, %s41_s13, [#allocation5], %s855_s17, %s855_s17, %s856_s18  }
   0x6   :  { %s857_s19 = smov [#allocation2]   ;;  %s53_s23 = sshll.u32 %s945_s5, 4  ;;  %s54_s23 = int_to_ptr.hbm [resolvable:$true] %s53_s23 }
   0x7   :  { %s25_s20 = sshll.u32 %s857_s19, 4  ;;  %s68_s25 = sshll.u32 %s947_s7, 4  ;;  %s26_s20 = int_to_ptr.vmem [resolvable:$true] %s25_s20  ;;  %s69_s25 = int_to_ptr.hbm [resolvable:$true] %s68_s25 }
   0x8   :  { %31 = dma.hbm_to_vmem [thread:$0]  %s24_s16, 1024, %s26_s20, [#allocation3], %s855_s17, %s855_s17, %s856_s18  }
   0x9   :  { %s858_s26 = smov [#allocation6]   ;;  %s859_s1 = smov [#allocation7]  }
   0xa   :  { %s55_s27 = sshll.u32 %s858_s26, 4  ;;  %s70_s28 = sshll.u32 %s859_s1, 4  ;;  %s56_s27 = int_to_ptr.vmem [resolvable:$true] %s55_s27  ;;  %s71_s28 = int_to_ptr.vmem [resolvable:$true] %s70_s28 }
   0xb   :  { %61 = dma.hbm_to_vmem [thread:$0]  %s54_s23, 1024, %s56_s27, [#allocation5], %s855_s17, %s855_s17, %s856_s18  }
   0xc   :  { %76 = dma.hbm_to_vmem [thread:$0]  %s69_s25, 1024, %s71_s28, [#allocation8], %s855_s17, %s855_s17, %s856_s18  }
   0xd   :  { %848 = dma.done.wait [#allocation3], 1024  }
   0xe   :  { %849 = vsyncadd [#allocation3], 4294966272 }
   0xf   :  { %850 = dma.done.wait [#allocation5], 2048  }
  0x10   :  { %851 = vsyncadd [#allocation5], 4294965248 }
  0x11   :  { %852 = dma.done.wait [#allocation8], 1024  }
  0x12   :  { %853 = vsyncadd [#allocation8], 4294966272  ;;  %v696_v0 = vld [vmem:[#allocation2 + $0x38] sm:$0xff]  ;;  %v695_v1 = vld [vmem:[#allocation2 + $0x30] sm:$0xff] }
  0x13   :  { %171 = vmatpush.bf16.msra.mxu0 %v696_v0  ;;  %v694_v2 = vld [vmem:[#allocation2 + $0x28] sm:$0xff]  ;;  %v693_v3 = vld [vmem:[#allocation2 + $0x20] sm:$0xff]  ;;  %v692_v4 = vld [vmem:[#allocation2 + $0x18] sm:$0xff] }
  0x14   :  { %v691_v5 = vld [vmem:[#allocation2 + $0x10] sm:$0xff]  ;;  %v690_v6 = vld [vmem:[#allocation2 + $0x8] sm:$0xff]  ;;  %v689_v7 = vld [vmem:[#allocation2] sm:$0xff] }
  0x15   :  { %v688_v8 = vld [vmem:[%s940_s0] sm:$0xff]  ;;  %v704_v9 = vld [vmem:[#allocation4 + $0x38] sm:$0xff]  ;;  %v703_v10 = vld [vmem:[#allocation4 + $0x30] sm:$0xff] }
  0x16   :  { %287 = vmatpush.bf16.msra.mxu1 %v704_v9  ;;  %v702_v11 = vld [vmem:[#allocation4 + $0x28] sm:$0xff]  ;;  %v701_v12 = vld [vmem:[#allocation4 + $0x20] sm:$0xff]  ;;  %v700_v13 = vld [vmem:[#allocation4 + $0x18] sm:$0xff] }
  0x17   :  { %172 = vmatpush.bf16.msra.mxu0 %v695_v1  ;;  %v732_v14 = vld [vmem:[%s942_s2] ss:$0 sm:$0xff]  ;;  %v699_v15 = vld [vmem:[#allocation4 + $0x10] sm:$0xff]  ;;  %v698_v17 = vld [vmem:[#allocation4 + $0x8] sm:$0xff] }
  0x18   :  { %v697_v20 = vld [vmem:[#allocation4] sm:$0xff]  ;;  %v712_v49 = vld [vmem:[#allocation6 + $0x38] sm:$0xff]  ;;  %v711_v50 = vld [vmem:[#allocation6 + $0x30] sm:$0xff] }
  0x19   :  { %403 = vmatpush.bf16.msra.mxu2 %v712_v49  ;;  %v710_v51 = vld [vmem:[#allocation6 + $0x28] sm:$0xff]  ;;  %v709_v52 = vld [vmem:[#allocation6 + $0x20] sm:$0xff]  ;;  %v708_v53 = vld [vmem:[#allocation6 + $0x18] sm:$0xff] }
  0x1a   :  { %288 = vmatpush.bf16.msra.mxu1 %v703_v10  ;;  %v733_v54 = vld [vmem:[%s944_s4] ss:$0 sm:$0xff]  ;;  %v707_v55 = vld [vmem:[#allocation6 + $0x10] sm:$0xff]  ;;  %v706_v57 = vld [vmem:[#allocation6 + $0x8] sm:$0xff] }
  0x1b   :  { %173 = vmatpush.bf16.msra.mxu0 %v694_v2  ;;  %v705_v60 = vld [vmem:[#allocation6] sm:$0xff] }
  0x1d   :  { %404 = vmatpush.bf16.msra.mxu2 %v711_v50 }
  0x1e   :  { %289 = vmatpush.bf16.msra.mxu1 %v702_v11 }
  0x1f   :  { %174 = vmatpush.bf16.msra.mxu0 %v693_v3 }
  0x21   :  { %405 = vmatpush.bf16.msra.mxu2 %v710_v51 }
  0x22   :  { %290 = vmatpush.bf16.msra.mxu1 %v701_v12 }
  0x23   :  { %175 = vmatpush.bf16.msra.mxu0 %v692_v4 }
  0x25   :  { %406 = vmatpush.bf16.msra.mxu2 %v709_v52 }
  0x26   :  { %291 = vmatpush.bf16.msra.mxu1 %v700_v13 }
  0x27   :  { %176 = vmatpush.bf16.msra.mxu0 %v691_v5 }
  0x29   :  { %407 = vmatpush.bf16.msra.mxu2 %v708_v53 }
  0x2a   :  { %292 = vmatpush.bf16.msra.mxu1 %v699_v15 }
  0x2b   :  { %177 = vmatpush.bf16.msra.mxu0 %v690_v6 }
  0x2d   :  { %408 = vmatpush.bf16.msra.mxu2 %v707_v55 }
  0x2e   :  { %293 = vmatpush.bf16.msra.mxu1 %v698_v17 }
  0x2f   :  { %178 = vmatpush.bf16.msra.mxu0 %v689_v7 }
  0x31   :  { %409 = vmatpush.bf16.msra.mxu2 %v706_v57 }
  0x32   :  { %179 = vmatmul.bf16.vlgmr.msra.gmra.mxu0 %v688_v8  ;;  %294 = vmatpush.bf16.msra.mxu1 %v697_v20 }
  0x35   :  { %410 = vmatpush.bf16.msra.mxu2 %v705_v60 }
  0xaf   :  { %v180_v16 = vpop.f32.mrf.mxu0 }
  0xb0   :  { %v181_v18 = vadd.f32 %v732_v14, %v180_v16 }
  0xb2   :  { %v185_v19 = vpack.c.bf16 %v181_v18, %v181_v18 }
  0xb4   :  { %v187_v21 = vunpack.c.l.bf16 %v185_v19 }
  0xb6   :  { %v191_v22 = vmul.f32 1.442695, %v187_v21  ;;  %vm189_vm0 = vcmp.gt.f32.partialorder %v187_v21, 0.0 }
  0xb7   :  { %v182_v23 = vpop.f32.mrf.mxu0  ;;  %vm209_vm2 = vmpackc.low %vm189_vm0, %vm189_vm0 }
  0xb8   :  { %736 = vpow2.f32 %v191_v22  ;;  %v183_v24 = vadd.f32 %v732_v14, %v182_v23 }
  0xba   :  { %v186_v25 = vpack.c.bf16 %v183_v24, %v183_v24 }
  0xbc   :  { %v188_v26 = vunpack.c.l.bf16 %v186_v25 }
  0xbe   :  { %v737_v27 = vpop.eup %736  ;;  %v193_v28 = vmul.f32 1.442695, %v188_v26  ;;  %vm190_vm1 = vcmp.gt.f32.partialorder %v188_v26, 0.0  ;;  %v719_v26 = vld [vmem:[#allocation7 + $0x30] sm:$0xff] }
  0xbf   :  { %v195_v29 = vpack.c.bf16 %v737_v27, %v737_v27  ;;  %vm210_vm3 = vmpackc.low %vm190_vm1, %vm190_vm1  ;;  %v718_v27 = vld [vmem:[#allocation7 + $0x28] sm:$0xff] }
  0xc0   :  { %738 = vpow2.f32 %v193_v28  ;;  %v717_v28 = vld [vmem:[#allocation7 + $0x20] sm:$0xff] }
  0xc1   :  { %v197_v30 = vunpack.c.l.bf16 %v195_v29  ;;  %v716_v29 = vld [vmem:[#allocation7 + $0x18] sm:$0xff] }
  0xc3   :  { %v586_v31 = vadd.f32 -1.0, %v197_v30  ;;  %v734_v30 = vld [vmem:[%s946_s6] ss:$0 sm:$0xff] }
  0xc5   :  { %v201_v32 = vpack.c.bf16 %v586_v31, %v586_v31  ;;  %v715_v31 = vld [vmem:[#allocation7 + $0x10] sm:$0xff] }
  0xc6   :  { %v739_v33 = vpop.eup %738 }
  0xc7   :  { %v196_v34 = vpack.c.bf16 %v739_v33, %v739_v33  ;;  %v203_v35 = vunpack.c.l.bf16 %v201_v32  ;;  %v714_v33 = vld [vmem:[#allocation7 + $0x8] sm:$0xff] }
  0xc9   :  { %v198_v36 = vunpack.c.l.bf16 %v196_v34  ;;  %v205_v38 = vmul.f32 0.20019531, %v203_v35 }
  0xcb   :  { %v587_v37 = vadd.f32 -1.0, %v198_v36  ;;  %v207_v41 = vpack.c.bf16 %v205_v38, %v205_v38  ;;  %v713_v36 = vld [vmem:[#allocation7] sm:$0xff] }
  0xcd   :  { %v202_v39 = vpack.c.bf16 %v587_v37, %v587_v37  ;;  %v211_v44 = vsel %vm209_vm2, %v185_v19, %v207_v41 }
  0xce   :  { %v235_v46 = vunpack.c.l.b16 %v211_v44 }
  0xcf   :  { %v204_v40 = vunpack.c.l.bf16 %v202_v39 }
  0xd1   :  { %v206_v42 = vmul.f32 0.20019531, %v204_v40 }
  0xd3   :  { %v208_v43 = vpack.c.bf16 %v206_v42, %v206_v42 }
  0xd5   :  { %v212_v45 = vsel %vm210_vm3, %v186_v25, %v208_v43  ;;  %v720_v25 = vld [vmem:[#allocation7 + $0x38] sm:$0xff] }
  0xd6   :  { %v236_v47 = vunpack.c.l.b16 %v212_v45  ;;  %519 = vmatpush.bf16.msra.mxu3 %v720_v25 }
  0xd8   :  { %v237_v48 = vpack.c.b16 %v236_v47, %v235_v46 }
  0xda   :  { %295 = vmatmul.bf16.vlgmr.msra.gmra.mxu1 %v237_v48  ;;  %520 = vmatpush.bf16.msra.mxu3 %v719_v26 }
  0xde   :  { %521 = vmatpush.bf16.msra.mxu3 %v718_v27 }
  0xe2   :  { %522 = vmatpush.bf16.msra.mxu3 %v717_v28 }
  0xe6   :  { %523 = vmatpush.bf16.msra.mxu3 %v716_v29 }
  0xea   :  { %524 = vmatpush.bf16.msra.mxu3 %v715_v31 }
  0xee   :  { %525 = vmatpush.bf16.msra.mxu3 %v714_v33 }
  0xf2   :  { %526 = vmatpush.bf16.msra.mxu3 %v713_v36 }
 0x157   :  { %v296_v56 = vpop.f32.mrf.mxu1 }
 0x158   :  { %v297_v58 = vadd.f32 %v733_v54, %v296_v56 }
 0x15a   :  { %v301_v59 = vpack.c.bf16 %v297_v58, %v297_v58 }
 0x15c   :  { %v303_v61 = vunpack.c.l.bf16 %v301_v59 }
 0x15e   :  { %v307_v62 = vmul.f32 1.442695, %v303_v61  ;;  %vm305_vm4 = vcmp.gt.f32.partialorder %v303_v61, 0.0 }
 0x15f   :  { %v298_v63 = vpop.f32.mrf.mxu1  ;;  %vm325_vm6 = vmpackc.low %vm305_vm4, %vm305_vm4 }
 0x160   :  { %740 = vpow2.f32 %v307_v62  ;;  %v299_v0 = vadd.f32 %v733_v54, %v298_v63 }
 0x162   :  { %v302_v1 = vpack.c.bf16 %v299_v0, %v299_v0 }
 0x164   :  { %v304_v2 = vunpack.c.l.bf16 %v302_v1 }
 0x166   :  { %v741_v3 = vpop.eup %740  ;;  %v309_v4 = vmul.f32 1.442695, %v304_v2  ;;  %vm306_vm5 = vcmp.gt.f32.partialorder %v304_v2, 0.0 }
 0x167   :  { %v311_v5 = vpack.c.bf16 %v741_v3, %v741_v3  ;;  %vm326_vm7 = vmpackc.low %vm306_vm5, %vm306_vm5 }
 0x168   :  { %742 = vpow2.f32 %v309_v4 }
 0x169   :  { %v313_v6 = vunpack.c.l.bf16 %v311_v5 }
 0x16b   :  { %v620_v7 = vadd.f32 -1.0, %v313_v6 }
 0x16d   :  { %v317_v8 = vpack.c.bf16 %v620_v7, %v620_v7 }
 0x16e   :  { %v743_v9 = vpop.eup %742 }
 0x16f   :  { %v312_v10 = vpack.c.bf16 %v743_v9, %v743_v9  ;;  %v319_v11 = vunpack.c.l.bf16 %v317_v8 }
 0x171   :  { %v314_v12 = vunpack.c.l.bf16 %v312_v10  ;;  %v321_v14 = vmul.f32 0.20019531, %v319_v11 }
 0x173   :  { %v621_v13 = vadd.f32 -1.0, %v314_v12  ;;  %v323_v17 = vpack.c.bf16 %v321_v14, %v321_v14 }
 0x175   :  { %v318_v15 = vpack.c.bf16 %v621_v13, %v621_v13  ;;  %v327_v20 = vsel %vm325_vm6, %v301_v59, %v323_v17 }
 0x176   :  { %v351_v22 = vunpack.c.l.b16 %v327_v20 }
 0x177   :  { %v320_v16 = vunpack.c.l.bf16 %v318_v15 }
 0x179   :  { %v322_v18 = vmul.f32 0.20019531, %v320_v16 }
 0x17b   :  { %v324_v19 = vpack.c.bf16 %v322_v18, %v322_v18 }
 0x17d   :  { %v328_v21 = vsel %vm326_vm7, %v302_v1, %v324_v19  ;;  %v735_v1 = vld [vmem:[%s948_s8] ss:$0 sm:$0xff] }
 0x17e   :  { %v352_v23 = vunpack.c.l.b16 %v328_v21 }
 0x180   :  { %v353_v24 = vpack.c.b16 %v352_v23, %v351_v22 }
 0x182   :  { %411 = vmatmul.bf16.vlgmr.msra.gmra.mxu2 %v353_v24 }
 0x205   :  { %v412_v32 = vpop.f32.mrf.mxu2 }
 0x206   :  { %v413_v34 = vadd.f32 %v734_v30, %v412_v32 }
 0x208   :  { %v417_v35 = vpack.c.bf16 %v413_v34, %v413_v34 }
 0x20a   :  { %v419_v37 = vunpack.c.l.bf16 %v417_v35 }
 0x20c   :  { %v423_v38 = vmul.f32 1.442695, %v419_v37  ;;  %vm421_vm8 = vcmp.gt.f32.partialorder %v419_v37, 0.0 }
 0x20d   :  { %v414_v39 = vpop.f32.mrf.mxu2  ;;  %vm441_vm10 = vmpackc.low %vm421_vm8, %vm421_vm8 }
 0x20e   :  { %744 = vpow2.f32 %v423_v38  ;;  %v415_v40 = vadd.f32 %v734_v30, %v414_v39 }
 0x210   :  { %v418_v41 = vpack.c.bf16 %v415_v40, %v415_v40 }
 0x212   :  { %v420_v42 = vunpack.c.l.bf16 %v418_v41 }
 0x214   :  { %v745_v43 = vpop.eup %744  ;;  %v425_v44 = vmul.f32 1.442695, %v420_v42  ;;  %vm422_vm9 = vcmp.gt.f32.partialorder %v420_v42, 0.0 }
 0x215   :  { %v427_v45 = vpack.c.bf16 %v745_v43, %v745_v43  ;;  %vm442_vm11 = vmpackc.low %vm422_vm9, %vm422_vm9 }
 0x216   :  { %746 = vpow2.f32 %v425_v44 }
 0x217   :  { %v429_v46 = vunpack.c.l.bf16 %v427_v45 }
 0x219   :  { %v654_v47 = vadd.f32 -1.0, %v429_v46 }
 0x21b   :  { %v433_v48 = vpack.c.bf16 %v654_v47, %v654_v47 }
 0x21c   :  { %v747_v49 = vpop.eup %746 }
 0x21d   :  { %v428_v50 = vpack.c.bf16 %v747_v49, %v747_v49  ;;  %v435_v51 = vunpack.c.l.bf16 %v433_v48 }
 0x21f   :  { %v430_v52 = vunpack.c.l.bf16 %v428_v50  ;;  %v437_v54 = vmul.f32 0.20019531, %v435_v51 }
 0x221   :  { %v655_v53 = vadd.f32 -1.0, %v430_v52  ;;  %v439_v57 = vpack.c.bf16 %v437_v54, %v437_v54 }
 0x223   :  { %v434_v55 = vpack.c.bf16 %v655_v53, %v655_v53  ;;  %v443_v60 = vsel %vm441_vm10, %v417_v35, %v439_v57 }
 0x224   :  { %v467_v62 = vunpack.c.l.b16 %v443_v60 }
 0x225   :  { %v436_v56 = vunpack.c.l.bf16 %v434_v55 }
 0x227   :  { %v438_v58 = vmul.f32 0.20019531, %v436_v56 }
 0x229   :  { %v440_v59 = vpack.c.bf16 %v438_v58, %v438_v58 }
 0x22b   :  { %v444_v61 = vsel %vm442_vm11, %v418_v41, %v440_v59 }
 0x22c   :  { %v468_v63 = vunpack.c.l.b16 %v444_v61 }
 0x22e   :  { %v469_v0 = vpack.c.b16 %v468_v63, %v467_v62 }
 0x230   :  { %527 = vmatmul.bf16.vlgmr.msra.gmra.mxu3 %v469_v0 }
 0x2b3   :  { %v528_v2 = vpop.f32.mrf.mxu3 }
 0x2b4   :  { %v529_v3 = vadd.f32 %v735_v1, %v528_v2 }
 0x2b6   :  { %v533_v4 = vpack.c.bf16 %v529_v3, %v529_v3 }
 0x2b8   :  { %v535_v7 = vunpack.c.l.bf16 %v533_v4 }
 0x2ba   :  { %748 = vtanh.f32 %v535_v7 }
 0x2bb   :  { %v530_v5 = vpop.f32.mrf.mxu3 }
 0x2bc   :  { %v531_v6 = vadd.f32 %v735_v1, %v530_v5 }
 0x2be   :  { %v534_v8 = vpack.c.bf16 %v531_v6, %v531_v6 }
 0x2c0   :  { %v536_v9 = vunpack.c.l.bf16 %v534_v8  ;;  %v749_v10 = vpop.eup %748 }
 0x2c2   :  { %750 = vtanh.f32 %v536_v9 }
 0x2c8   :  { %v751_v11 = vpop.eup %750 }
 0x2c9   :  { %v724_v12 = vpack.c.bf16 %v751_v11, %v749_v10 }
 0x2cb   :  { %725 = vst [vmem:[%s949_s9] sm:$0xff] %v724_v12  }
 0x2cc   :  { %547 = vsyncpa [#allocation3], 1 }
 0x2cd   :  { %548 = vsyncpa [#allocation5], 1 }
 0x2ce   :  { %549 = vsyncpa [#allocation8], 1 }

</bundles_post_ra>
